<compile_context>
chip_gen: v7x
topology: tpu7x:2x2x1
jax: 0.10.0
libtpu: 0.0.40
codegen_flags: <defaults>
</compile_context>

<pallas_src>
import jax
import jax.numpy as jnp
from jax.experimental import pallas as pl
from jax.experimental.pallas import tpu as pltpu


NUM_CLASSES = 10
IN_FEATURES = 28 * 28      # 784 -- no K padding (full-dim block is lane-legal)
HIDDEN = 128
OUT_PAD = 128              # lane-dense output slab width (>= NUM_CLASSES)
MAX_TILE_B = 2048          # f32 x-tile ~6.3 MiB; dbl-buffered + temps well under 40 MiB
MIN_SPLIT_B = 128          # above this, force >= 2 grid tiles (v7x 2-TC split)
NEG_BIG = -1e30            # pad-column bias -> excluded from softmax


def _round_up(x, m):
    return ((x + m - 1) // m) * m


def _choose_tiles(batch):
    """(tile_b, padded_batch): balanced tiles, rows a multiple of 8, >=2 tiles
    for larger batches so both v7x TensorCores get work, minimal batch padding."""
    if batch <= MIN_SPLIT_B:
        tile_b = _round_up(batch, 8)
        return tile_b, tile_b
    num_tiles = max(2, pl.cdiv(batch, MAX_TILE_B))
    tile_b = _round_up(pl.cdiv(batch, num_tiles), 8)
    return tile_b, tile_b * num_tiles


def mlp_logsoftmax_kernel(x_ref, w1_ref, b1_ref, w2_ref, b2_ref, out_ref):
    # x_ref:  (tile_b, 784)  f32   -> cast to bf16 in VMEM (no extra HBM pass)
    # w1_ref: (784, 128)     bf16  (resident)    b1_ref: (1, 128)     f32
    # w2_ref: (128, 128)     bf16  (resident)    b2_ref: (1, 128)     f32 (pad cols = -1e30)
    # out_ref:(tile_b, 128)  f32   (lane-dense slab)
    x_bf16 = x_ref[...].astype(jnp.bfloat16)

    # fc1 + ReLU: bf16 operands on the MXU, f32 accumulation / elementwise.
    h = jnp.dot(x_bf16, w1_ref[...], preferred_element_type=jnp.float32)
    h = jnp.maximum(h + b1_ref[...], 0.0)

    # fc2 over a full 128-lane output tile (pad columns get -1e30 bias).
    logits = jnp.dot(h.astype(jnp.bfloat16), w2_ref[...],
                     preferred_element_type=jnp.float32) + b2_ref[...]

    # Numerically stable log_softmax in f32. Pad columns sit at ~-1e30 so they
    # never win the max and exp() underflows to exactly 0 in the sum.
    m = jnp.max(logits, axis=-1, keepdims=True)
    shifted = logits - m
    lse = jnp.log(jnp.sum(jnp.exp(shifted), axis=-1, keepdims=True))
    out_ref[...] = (shifted - lse).astype(out_ref.dtype)


def prepare_params(w1, b1, w2, b2):
    """One-time prep of torch-shaped params (stored as (in, out))."""
    num_classes = w2.shape[1]
    w1p = w1.astype(jnp.bfloat16)                           # (784, 128), no K pad
    b1p = b1.reshape(1, HIDDEN).astype(jnp.float32)
    # fc2: pad N num_classes -> 128 with zero columns; bias pad columns = -1e30.
    w2p = jnp.pad(w2, ((0, 0), (0, OUT_PAD - num_classes))).astype(jnp.bfloat16)
    b2p = jnp.full((1, OUT_PAD), NEG_BIG, jnp.float32)
    b2p = b2p.at[0, :num_classes].set(b2.astype(jnp.float32))
    return w1p, b1p, w2p, b2p


def net_forward(x_nchw, w1p, b1p, w2p, b2p, num_classes=NUM_CLASSES):
    """x_nchw: (B, 1, 28, 28) -> (B, num_classes) f32 log-probabilities."""
    B = x_nchw.shape[0]
    x_flat = x_nchw.reshape(B, IN_FEATURES).astype(jnp.float32)

    tile_b, b_pad = _choose_tiles(B)
    if b_pad != B:
        # At most a handful of zero rows (balanced tiling keeps padding tiny);
        # padded rows produce finite garbage rows that are sliced off below.
        x_flat = jnp.pad(x_flat, ((0, b_pad - B), (0, 0)))
    grid = (b_pad // tile_b,)

    out = pl.pallas_call(
        mlp_logsoftmax_kernel,
        out_shape=jax.ShapeDtypeStruct((b_pad, OUT_PAD), jnp.float32),
        grid=grid,
        in_specs=[
            pl.BlockSpec((tile_b, IN_FEATURES), lambda i: (i, 0)),   # x: streamed per tile
            pl.BlockSpec((IN_FEATURES, HIDDEN), lambda i: (0, 0)),   # w1: VMEM-resident
            pl.BlockSpec((1, HIDDEN), lambda i: (0, 0)),             # b1: resident
            pl.BlockSpec((HIDDEN, OUT_PAD), lambda i: (0, 0)),       # w2: resident
            pl.BlockSpec((1, OUT_PAD), lambda i: (0, 0)),            # b2: resident
        ],
        out_specs=pl.BlockSpec((tile_b, OUT_PAD), lambda i: (i, 0)),
        compiler_params=pltpu.CompilerParams(
            dimension_semantics=("parallel",),       # shard batch tiles across TCs
            vmem_limit_bytes=40 * 1024 * 1024,       # large tiles OK on v5e's 16 MiB default
        ),
    )(x_flat, w1p, b1p, w2p, b2p)

    # Module contract is (B, num_classes) log-probs; drop batch/class padding.
    return out[:B, :num_classes]


def init_params(key):
    """Deterministic init matching torch.nn.Linear shapes (stored as (in, out))."""
    k1, k2, k3, k4 = jax.random.split(key, 4)
    bound1 = 1.0 / (IN_FEATURES ** 0.5)
    bound2 = 1.0 / (HIDDEN ** 0.5)
    w1 = jax.random.uniform(k1, (IN_FEATURES, HIDDEN), jnp.float32, -bound1, bound1)
    b1 = jax.random.uniform(k2, (HIDDEN,), jnp.float32, -bound1, bound1)
    w2 = jax.random.uniform(k3, (HIDDEN, NUM_CLASSES), jnp.float32, -bound2, bound2)
    b2 = jax.random.uniform(k4, (NUM_CLASSES,), jnp.float32, -bound2, bound2)
    return w1, b1, w2, b2


if __name__ == "__main__":
    key = jax.random.PRNGKey(0)
    k_x, k_p = jax.random.split(key)

    # Small MNIST-like batch: (B, C, H, W) = (8, 1, 28, 28)
    x = jax.random.normal(k_x, (8, 1, 28, 28), jnp.float32)
    w1, b1, w2, b2 = init_params(k_p)
    w1p, b1p, w2p, b2p = prepare_params(w1, b1, w2, b2)

    fwd = jax.jit(lambda xs: net_forward(xs, w1p, b1p, w2p, b2p))
    out = fwd(x)
    jax.block_until_ready(out)

    # Reference check (pure JAX, f32): bf16 MXU operands -> ~1e-2 abs tolerance.
    x_flat = x.reshape(8, -1)
    ref_logits = jnp.maximum(x_flat @ w1 + b1, 0.0) @ w2 + b2
    ref = jax.nn.log_softmax(ref_logits, axis=1)
    probs_sum = jnp.sum(jnp.exp(out), axis=1)

    assert out.shape == (8, NUM_CLASSES)
    assert bool(jnp.all(jnp.isfinite(out)))
    assert bool(jnp.all(jnp.abs(probs_sum - 1.0) < 1e-4))
    assert bool(jnp.max(jnp.abs(out - ref)) < 5e-2)

    print("KERNEL_OK")
</pallas_src>

<mosaic_0001>
module attributes {stable_mosaic.version = 11 : i64} {
  func.func @mlp_logsoftmax_kernel(%arg0: i32, %arg1: memref<8x784xf32, #tpu.memory_space<vmem>>, %arg2: memref<784x128xbf16, #tpu.memory_space<vmem>>, %arg3: memref<1x128xf32, #tpu.memory_space<vmem>>, %arg4: memref<128x128xbf16, #tpu.memory_space<vmem>>, %arg5: memref<1x128xf32, #tpu.memory_space<vmem>>, %arg6: memref<8x128xf32, #tpu.memory_space<vmem>>) attributes {dimension_semantics = [#tpu.dimension_semantics<parallel>], iteration_bounds = array<i64: 1>, scalar_prefetch = 0 : i64, scratch_operands = 0 : i64, tpu.core_type = #tpu.core_type<tc>, window_params = [{transform_indices = @transform_0, window_bounds = array<i64: 8, 784>}, {pipeline_mode = #tpu.pipeline_mode<synchronous>, transform_indices = @transform_1, window_bounds = array<i64: 784, 128>}, {pipeline_mode = #tpu.pipeline_mode<synchronous>, transform_indices = @transform_2, window_bounds = array<i64: 1, 128>}, {pipeline_mode = #tpu.pipeline_mode<synchronous>, transform_indices = @transform_3, window_bounds = array<i64: 128, 128>}, {pipeline_mode = #tpu.pipeline_mode<synchronous>, transform_indices = @transform_4, window_bounds = array<i64: 1, 128>}, {transform_indices = @transform_5, window_bounds = array<i64: 8, 128>}]} {
    %c0 = arith.constant 0 : index
    %c0_0 = arith.constant 0 : index
    %0 = vector.load %arg1[%c0, %c0_0] : memref<8x784xf32, #tpu.memory_space<vmem>>, vector<8x784xf32>
    %1 = arith.truncf %0 : vector<8x784xf32> to vector<8x784xbf16>
    %c0_1 = arith.constant 0 : index
    %c0_2 = arith.constant 0 : index
    %2 = vector.load %arg2[%c0_1, %c0_2] : memref<784x128xbf16, #tpu.memory_space<vmem>>, vector<784x128xbf16>
    %cst = arith.constant dense<0.000000e+00> : vector<8x128xf32>
    %3 = tpu.matmul %1, %2, %cst {dimension_numbers = #tpu.dot_dimension_numbers<[1], [0], [0], [1], [0, 0, 1, 1], [], []>} : vector<8x784xbf16>, vector<784x128xbf16>, vector<8x128xf32> -> vector<8x128xf32>
    %c0_3 = arith.constant 0 : index
    %c0_4 = arith.constant 0 : index
    %4 = vector.load %arg3[%c0_3, %c0_4] : memref<1x128xf32, #tpu.memory_space<vmem>>, vector<1x128xf32>
    %5 = vector.broadcast %4 : vector<1x128xf32> to vector<8x128xf32>
    %6 = arith.addf %3, %5 : vector<8x128xf32>
    %cst_5 = arith.constant 0.000000e+00 : f32
    %7 = vector.broadcast %cst_5 : f32 to vector<8x128xf32>
    %8 = arith.maximumf %6, %7 : vector<8x128xf32>
    %9 = arith.truncf %8 : vector<8x128xf32> to vector<8x128xbf16>
    %c0_6 = arith.constant 0 : index
    %c0_7 = arith.constant 0 : index
    %10 = vector.load %arg4[%c0_6, %c0_7] : memref<128x128xbf16, #tpu.memory_space<vmem>>, vector<128x128xbf16>
    %cst_8 = arith.constant dense<0.000000e+00> : vector<8x128xf32>
    %11 = tpu.matmul %9, %10, %cst_8 {dimension_numbers = #tpu.dot_dimension_numbers<[1], [0], [0], [1], [0, 0, 1, 1], [], []>} : vector<8x128xbf16>, vector<128x128xbf16>, vector<8x128xf32> -> vector<8x128xf32>
    %c0_9 = arith.constant 0 : index
    %c0_10 = arith.constant 0 : index
    %12 = vector.load %arg5[%c0_9, %c0_10] : memref<1x128xf32, #tpu.memory_space<vmem>>, vector<1x128xf32>
    %13 = vector.broadcast %12 : vector<1x128xf32> to vector<8x128xf32>
    %14 = arith.addf %11, %13 : vector<8x128xf32>
    %cst_11 = arith.constant dense<0xFF800000> : vector<8xf32>
    %15 = vector.multi_reduction <maximumf>, %14, %cst_11 [1] : vector<8x128xf32> to vector<8xf32>
    %16 = vector.shape_cast %15 : vector<8xf32> to vector<8x1xf32>
    %17 = vector.broadcast %16 : vector<8x1xf32> to vector<8x128xf32>
    %18 = arith.subf %14, %17 : vector<8x128xf32>
    %19 = math.exp %18 : vector<8x128xf32>
    %cst_12 = arith.constant dense<0.000000e+00> : vector<8xf32>
    %20 = vector.multi_reduction <add>, %19, %cst_12 [1] : vector<8x128xf32> to vector<8xf32>
    %21 = vector.shape_cast %20 : vector<8xf32> to vector<8x1xf32>
    %22 = math.log %21 : vector<8x1xf32>
    %23 = vector.broadcast %22 : vector<8x1xf32> to vector<8x128xf32>
    %24 = arith.subf %18, %23 : vector<8x128xf32>
    %c0_13 = arith.constant 0 : index
    %c0_14 = arith.constant 0 : index
    %25 = vector.load %arg6[%c0_13, %c0_14] : memref<8x128xf32, #tpu.memory_space<vmem>>, vector<8x128xf32>
    tpu.vector_store %arg6[%c0_13, %c0_14], %24 {strides = array<i32>} : memref<8x128xf32, #tpu.memory_space<vmem>>, vector<8x128xf32>,
    return
  }
  func.func @transform_0(%arg0: i32) -> (i32, i32) {
    %c0_i32 = arith.constant 0 : i32
    %c0_i32_0 = arith.constant 0 : i32
    return %arg0, %c0_i32 : i32, i32
  }
  func.func @transform_1(%arg0: i32) -> (i32, i32) {
    %c0_i32 = arith.constant 0 : i32
    %c0_i32_0 = arith.constant 0 : i32
    %c0_i32_1 = arith.constant 0 : i32
    return %c0_i32, %c0_i32_0 : i32, i32
  }
  func.func @transform_2(%arg0: i32) -> (i32, i32) {
    %c0_i32 = arith.constant 0 : i32
    %c0_i32_0 = arith.constant 0 : i32
    %c0_i32_1 = arith.constant 0 : i32
    return %c0_i32, %c0_i32_0 : i32, i32
  }
  func.func @transform_3(%arg0: i32) -> (i32, i32) {
    %c0_i32 = arith.constant 0 : i32
    %c0_i32_0 = arith.constant 0 : i32
    %c0_i32_1 = arith.constant 0 : i32
    return %c0_i32, %c0_i32_0 : i32, i32
  }
  func.func @transform_4(%arg0: i32) -> (i32, i32) {
    %c0_i32 = arith.constant 0 : i32
    %c0_i32_0 = arith.constant 0 : i32
    %c0_i32_1 = arith.constant 0 : i32
    return %c0_i32, %c0_i32_0 : i32, i32
  }
  func.func @transform_5(%arg0: i32) -> (i32, i32) {
    %c0_i32 = arith.constant 0 : i32
    %c0_i32_0 = arith.constant 0 : i32
    return %arg0, %c0_i32 : i32, i32
  }
}

</mosaic_0001>

<bundles_post_ra>
// kernel: _lambda_.1
= control target key start
LH: loop header
LB: loop body
LE: loop exit
PB: predicated region body
PF: predicated region fallthrough
CT: control target
= control target key end

     0   :  { %v988_v44 = vmov 0.0   ;;  %vm989_vm0 = vmmov 0   ;;  %vm435_vm1 = vcmask 130048   ;;  %s1244_s0 = inlined_call_operand.vmem [shape: f32[8,784], index: 0, kind: input, shape index: {}]   ;;  %s1245_s1 = inlined_call_operand.vmem [shape: bf16[784,128], index: 1, kind: input, shape index: {}]   ;;  %s1246_s2 = inlined_call_operand.vmem [shape: f32[1,128], index: 2, kind: input, shape index: {}]   ;;  %s1247_s3 = inlined_call_operand.vmem [shape: bf16[128,128], index: 3, kind: input, shape index: {}]   ;;  %s1248_s4 = inlined_call_operand.vmem [shape: f32[1,128], index: 4, kind: input, shape index: {}]   ;;  %s1249_s5 = inlined_call_operand.hbm [shape: f32[8,128], index: 5, kind: output, shape index: {}]  }
   0x1   :  { %v903_v0 = vld [vmem:[%s1245_s1 + $0x40] sm:$0xff]   ;;  %v907_v4 = vld [vmem:[%s1245_s1 + $0x48] sm:$0xff]   ;;  %v911_v8 = vld [vmem:[%s1245_s1 + $0x50] sm:$0xff]  }
   0x2   :  { %v904_v1 = vld [vmem:[%s1245_s1] sm:$0xff]   ;;  %797 = vmatprep.subr.bf16.mxu0 %v903_v0  ;;  %v908_v5 = vld [vmem:[%s1245_s1 + $0x8] sm:$0xff]   ;;  %v912_v9 = vld [vmem:[%s1245_s1 + $0x10] sm:$0xff]  }
   0x3   :  { %v905_v2 = vld [vmem:[%s1245_s1 + $0xc0] sm:$0xff]   ;;  %798 = vmatpush3.bf16.msra.mxu0 %v904_v1  ;;  %v909_v6 = vld [vmem:[%s1245_s1 + $0xc8] sm:$0xff]   ;;  %v913_v10 = vld [vmem:[%s1245_s1 + $0xd0] sm:$0xff]  }
   0x4   :  { %v906_v3 = vld [vmem:[%s1245_s1 + $0x80] sm:$0xff]   ;;  %819 = vmatprep.subr.bf16.mxu1 %v905_v2  ;;  %799 = vmatprep.subr.bf16.mxu0 %v907_v4  ;;  %v910_v7 = vld [vmem:[%s1245_s1 + $0x88] sm:$0xff]   ;;  %v914_v11 = vld [vmem:[%s1245_s1 + $0x90] sm:$0xff]  }
   0x5   :  { %820 = vmatpush3.bf16.msra.mxu1 %v906_v3  ;;  %v915_v12 = vld [vmem:[%s1245_s1 + $0x58] sm:$0xff]   ;;  %v919_v16 = vld [vmem:[%s1245_s1 + $0x60] sm:$0xff]   ;;  %v923_v20 = vld [vmem:[%s1245_s1 + $0x68] sm:$0xff]  }
   0x6   :  { %821 = vmatprep.subr.bf16.mxu1 %v909_v6  ;;  %v916_v13 = vld [vmem:[%s1245_s1 + $0x18] sm:$0xff]   ;;  %v920_v17 = vld [vmem:[%s1245_s1 + $0x20] sm:$0xff]   ;;  %v924_v21 = vld [vmem:[%s1245_s1 + $0x28] sm:$0xff]  }
   0x7   :  { %800 = vmatpush3.bf16.msra.mxu0 %v908_v5  ;;  %v917_v14 = vld [vmem:[%s1245_s1 + $0xd8] sm:$0xff]   ;;  %v921_v18 = vld [vmem:[%s1245_s1 + $0xe0] sm:$0xff]   ;;  %v925_v22 = vld [vmem:[%s1245_s1 + $0xe8] sm:$0xff]  }
   0x8   :  { %801 = vmatprep.subr.bf16.mxu0 %v911_v8  ;;  %v918_v15 = vld [vmem:[%s1245_s1 + $0x98] sm:$0xff]   ;;  %v922_v19 = vld [vmem:[%s1245_s1 + $0xa0] sm:$0xff]   ;;  %v926_v23 = vld [vmem:[%s1245_s1 + $0xa8] sm:$0xff]  }
   0x9   :  { %822 = vmatpush3.bf16.msra.mxu1 %v910_v7  ;;  %v927_v24 = vld [vmem:[%s1245_s1 + $0x70] sm:$0xff]   ;;  %v931_v28 = vld [vmem:[%s1245_s1 + $0x78] sm:$0xff]   ;;  %v23_v31 = vld [vmem:[%s1244_s0 + $0x8] sm:$0xff] }
   0xa   :  { %823 = vmatprep.subr.bf16.mxu1 %v913_v10  ;;  %v928_v25 = vld [vmem:[%s1245_s1 + $0x30] sm:$0xff]   ;;  %v932_v29 = vld [vmem:[%s1245_s1 + $0x38] sm:$0xff]   ;;  %v30_v32 = vpack.c.bf16 %v23_v31, %v23_v31  ;;  %v22_v34 = vld [vmem:[%s1244_s0] sm:$0xff] }
   0xb   :  { %802 = vmatpush3.bf16.msra.mxu0 %v912_v9  ;;  %v929_v26 = vld [vmem:[%s1245_s1 + $0xf0] sm:$0xff]   ;;  %v933_v30 = vld [vmem:[%s1245_s1 + $0xf8] sm:$0xff]   ;;  %v29_v35 = vpack.c.bf16 %v22_v34, %v22_v34  ;;  %v935_v36 = vld [vmem:[%s1245_s1 + $0x140] sm:$0xff]  }
   0xc   :  { %803 = vmatprep.subr.bf16.mxu0 %v915_v12  ;;  %v930_v27 = vld [vmem:[%s1245_s1 + $0xb0] sm:$0xff]   ;;  %v934_v33 = vld [vmem:[%s1245_s1 + $0xb8] sm:$0xff]   ;;  %471 = vmatprep.mubr.bf16.mxu0 %v30_v32  ;;  %v936_v39 = vld [vmem:[%s1245_s1 + $0x100] sm:$0xff]  }
   0xd   :  { %824 = vmatpush3.bf16.msra.mxu1 %v914_v11  ;;  %v25_v37 = vld [vmem:[%s1244_s0 + $0x18] sm:$0xff]  ;;  %v24_v40 = vld [vmem:[%s1244_s0 + $0x10] sm:$0xff]  ;;  %v937_v42 = vld [vmem:[%s1245_s1 + $0x148] sm:$0xff]  }
   0xe   :  { %825 = vmatprep.subr.bf16.mxu1 %v917_v14  ;;  %v32_v38 = vpack.c.bf16 %v25_v37, %v25_v37  ;;  %v31_v41 = vpack.c.bf16 %v24_v40, %v24_v40  ;;  %v938_v43 = vld [vmem:[%s1245_s1 + $0x108] sm:$0xff]   ;;  %v939_v45 = vld [vmem:[%s1245_s1 + $0x150] sm:$0xff]   ;;  %v941_v47 = vld [vmem:[%s1245_s1 + $0x158] sm:$0xff]  }
   0xf   :  { %804 = vmatpush3.bf16.msra.mxu0 %v916_v13  ;;  %v940_v46 = vld [vmem:[%s1245_s1 + $0x110] sm:$0xff]   ;;  %v942_v48 = vld [vmem:[%s1245_s1 + $0x118] sm:$0xff]   ;;  %v943_v49 = vld [vmem:[%s1245_s1 + $0x160] sm:$0xff]  }
  0x10   :  { %805 = vmatprep.subr.bf16.mxu0 %v919_v16  ;;  %511 = vmatprep.mubr.bf16.mxu1 %v32_v38  ;;  %v944_v50 = vld [vmem:[%s1245_s1 + $0x120] sm:$0xff]   ;;  %v945_v51 = vld [vmem:[%s1245_s1 + $0x168] sm:$0xff]   ;;  %v947_v55 = vld [vmem:[%s1245_s1 + $0x170] sm:$0xff]  }
  0x11   :  { %826 = vmatpush3.bf16.msra.mxu1 %v918_v15  ;;  %v946_v52 = vld [vmem:[%s1245_s1 + $0x128] sm:$0xff]   ;;  %v951_v53 = vld [vmem:[%s1245_s1 + $0x180] sm:$0xff]   ;;  %v28_v57 = vld [vmem:[%s1244_s0 + $0x30] sm:$0xff] }
  0x12   :  { %827 = vmatprep.subr.bf16.mxu1 %v921_v18  ;;  %v27_v54 = vld [vmem:[%s1244_s0 + $0x28] sm:$0xff]  ;;  %v35_v58 = vpack.c.bf16 %v28_v57, %v28_v57  ;;  %v948_v59 = vld [vmem:[%s1245_s1 + $0x130] sm:$0xff]  }
  0x13   :  { %806 = vmatpush3.bf16.msra.mxu0 %v920_v17  ;;  %v34_v56 = vpack.c.bf16 %v27_v54, %v27_v54 }
  0x14   :  { %807 = vmatprep.subr.bf16.mxu0 %v923_v20 }
  0x15   :  { %828 = vmatpush3.bf16.msra.mxu1 %v922_v19 }
  0x16   :  { %829 = vmatprep.subr.bf16.mxu1 %v925_v22 }
  0x17   :  { %808 = vmatpush3.bf16.msra.mxu0 %v924_v21 }
  0x18   :  { %809 = vmatprep.subr.bf16.mxu0 %v927_v24 }
  0x19   :  { %830 = vmatpush3.bf16.msra.mxu1 %v926_v23 }
  0x1a   :  { %831 = vmatprep.subr.bf16.mxu1 %v929_v26 }
  0x1b   :  { %810 = vmatpush3.bf16.msra.mxu0 %v928_v25 }
  0x1c   :  { %811 = vmatprep.subr.bf16.mxu0 %v931_v28 }
  0x1d   :  { %832 = vmatpush3.bf16.msra.mxu1 %v930_v27 }
  0x1e   :  { %833 = vmatprep.subr.bf16.mxu1 %v933_v30 }
  0x1f   :  { %812 = vmatpush3.bf16.msra.mxu0 %v932_v29 }
  0x20   :  { %841 = vmatprep.subr.bf16.mxu0 %v935_v36 }
  0x21   :  { %834 = vmatpush3.bf16.msra.mxu1 %v934_v33 }
  0x22   :  { %472 = vmatmul.mubr.bf16.vlgmr.msra.gmra.mrb[0].mxu0 %v29_v35  ;;  %874 = vmatprep.subr.bf16.mxu1 %v988_v44 }
  0x23   :  { %842 = vmatpush3.bf16.msra.mxu0 %v936_v39  ;;  %551 = vmatprep.mubr.bf16.mxu0 %v34_v56 }
  0x24   :  { %512 = vmatmul.mubr.bf16.vlgmr.msra.gmra.mrb[0].mxu1 %v31_v41  ;;  %843 = vmatprep.subr.bf16.mxu0 %v937_v42 }
  0x25   :  { %876 = vmatprep.mubr.msk.bf16.mxu1 %vm989_vm0, %v988_v44  ;;  %875 = vmatpush3.bf16.msra.mxu1 %v951_v53 }
  0x26   :  { %880 = vmatprep.subr.bf16.mxu1 %v988_v44 }
  0x27   :  { %844 = vmatpush3.bf16.msra.mxu0 %v938_v43 }
  0x28   :  { %845 = vmatprep.subr.bf16.mxu0 %v939_v45 }
  0x2b   :  { %846 = vmatpush3.bf16.msra.mxu0 %v940_v46 }
  0x2c   :  { %847 = vmatprep.subr.bf16.mxu0 %v941_v47  ;;  %877 = vmatmul.mubr.msk.bf16.vlgmr.msra.gmra.mrb[4].mxu1 %vm435_vm1, %v35_v58 }
  0x2d   :  { %896 = vmatprep.mubr.msk.bf16.mxu1 %vm989_vm0, %v988_v44 }
  0x2f   :  { %848 = vmatpush3.bf16.msra.mxu0 %v942_v48 }
  0x30   :  { %849 = vmatprep.subr.bf16.mxu0 %v943_v49 }
  0x33   :  { %850 = vmatpush3.bf16.msra.mxu0 %v944_v50 }
  0x34   :  { %851 = vmatprep.subr.bf16.mxu0 %v945_v51 }
  0x37   :  { %852 = vmatpush3.bf16.msra.mxu0 %v946_v52 }
  0x38   :  { %10 = vsyncpa [#allocation3], 0  ;;  %853 = vmatprep.subr.bf16.mxu0 %v947_v55  ;;  %v949_v60 = vld [vmem:[%s1245_s1 + $0x178] sm:$0xff]   ;;  %v26_v62 = vld [vmem:[%s1244_s0 + $0x20] sm:$0xff]  ;;  %s990_s21 = smov [#allocation2]  }
  0x39   :  { %v950_v61 = vld [vmem:[%s1245_s1 + $0x138] sm:$0xff]   ;;  %v33_v63 = vpack.c.bf16 %v26_v62, %v26_v62  ;;  %v952_v0 = vld [vmem:[%s1247_s3] sm:$0xff]   ;;  %v953_v1 = vld [vmem:[%s1247_s3 + $0x8] sm:$0xff]   ;;  %s729_s22 = sshll.u32 %s990_s21, 4  ;;  %s730_s22 = int_to_ptr.vmem [resolvable:$true] %s729_s22 }
  0x3a   :  { %881 = vmatpush3.bf16.msra.mxu1 %v952_v0  ;;  %v954_v2 = vld [vmem:[%s1247_s3 + $0x10] sm:$0xff]   ;;  %v955_v3 = vld [vmem:[%s1247_s3 + $0x18] sm:$0xff]   ;;  %v956_v4 = vld [vmem:[%s1247_s3 + $0x20] sm:$0xff]   ;;  %p969_p1 = scmp.lt.s32.totalorder %s730_s22, %s730_s22 }
  0x3b   :  { %854 = vmatpush3.bf16.msra.mxu0 %v948_v59  ;;  %882 = vmatprep.subr.bf16.mxu1 %v988_v44  ;;  %v957_v5 = vld [vmem:[%s1247_s3 + $0x28] sm:$0xff]   ;;  %v958_v6 = vld [vmem:[%s1247_s3 + $0x30] sm:$0xff]   ;;  %v959_v7 = vld [vmem:[%s1247_s3 + $0x38] sm:$0xff]  }
  0x3c   :  { %855 = vmatprep.subr.bf16.mxu0 %v949_v60  ;;  %v737_v9 = vld [vmem:[%s1246_s2] ss:$0 sm:$0xff] }
  0x3d   :  { %v788_v34 = vld [vmem:[%s1248_s4] ss:$0 sm:$0xff]  ;;  %s964_s4 = scalar_lea.vmem %s730_s22, 128 }
  0x3e   :  { %883 = vmatpush3.bf16.msra.mxu1 %v953_v1  ;;  %p965_p0 = scmp.ne.s32.totalorder %s730_s22, %s964_s4  ;;  %p970_p2 = scmp.lt.s32.totalorder %s964_s4, %s964_s4 }
  0x3f   :  { %856 = vmatpush3.bf16.msra.mxu0 %v950_v61  ;;  %884 = vmatprep.subr.bf16.mxu1 %v988_v44 }
  0x40   :  { %p971_p3 = por %p970_p2, %p969_p1 }
  0x42   :  { %552 = vmatmul.mubr.bf16.vlgmr.msra.gmra.mrb[4].mxu0 %v33_v63  ;;  %885 = vmatpush3.bf16.msra.mxu1 %v954_v2  ;;  %p972_p4 = pnand %p971_p3, %p965_p0 }
  0x43   :  { %886 = vmatprep.subr.bf16.mxu1 %v988_v44 }
  0x46   :  { %887 = vmatpush3.bf16.msra.mxu1 %v955_v3 }
  0x47   :  { %888 = vmatprep.subr.bf16.mxu1 %v988_v44 }
  0x4a   :  { %889 = vmatpush3.bf16.msra.mxu1 %v956_v4 }
  0x4b   :  { %890 = vmatprep.subr.bf16.mxu1 %v988_v44 }
  0x4e   :  { %891 = vmatpush3.bf16.msra.mxu1 %v957_v5 }
  0x4f   :  { %892 = vmatprep.subr.bf16.mxu1 %v988_v44 }
  0x52   :  { %893 = vmatpush3.bf16.msra.mxu1 %v958_v6 }
  0x53   :  { %894 = vmatprep.subr.bf16.mxu1 %v988_v44 }
  0x56   :  { %895 = vmatpush3.bf16.msra.mxu1 %v959_v7 }
  0xf5   :  { %v813_v8 = vpop.f32.mrb[0].mxu0 }
  0xf6   :  { %v814_v10 = vpop.f32.mrb[1].mxu0 }
  0xf7   :  { %v815_v11 = vadd.f32 %v814_v10, %v813_v8  ;;  %v816_v12 = vpop.f32.mrb[2].mxu0  ;;  %v835_v13 = vpop.f32.mrb[0].mxu1 }
  0xf8   :  { %v817_v14 = vpop.f32.mrb[3].mxu0  ;;  %v836_v16 = vpop.f32.mrb[1].mxu1 }
  0xf9   :  { %v474_v15 = vadd.f32 %v815_v11, %v737_v9  ;;  %v837_v17 = vadd.f32 %v836_v16, %v835_v13  ;;  %v838_v18 = vpop.f32.mrb[2].mxu1 }
  0xfa   :  { %v839_v19 = vpop.f32.mrb[3].mxu1 }
  0xfb   :  { %v514_v20 = vadd.f32 %v837_v17, %v474_v15 }
  0xff   :  { %v593_v21 = vpop.f32.mrb[4].mxu1 }
 0x100   :  { %v878_v22 = vpop.f32.mrb[5].mxu1 }
 0x101   :  { %v596_v23 = vpop.f32.mrb[6].mxu1 }
 0x102   :  { %v879_v24 = vpop.f32.mrb[7].mxu1 }
 0x115   :  { %v857_v25 = vpop.f32.mrb[4].mxu0 }
 0x116   :  { %v858_v26 = vpop.f32.mrb[5].mxu0 }
 0x117   :  { %v859_v27 = vadd.f32 %v858_v26, %v857_v25  ;;  %v860_v28 = vpop.f32.mrb[6].mxu0 }
 0x118   :  { %v861_v29 = vpop.f32.mrb[7].mxu0 }
 0x119   :  { %v554_v30 = vadd.f32 %v859_v27, %v514_v20 }
 0x11b   :  { %v594_v31 = vadd.f32 %v593_v21, %v554_v30 }
 0x11d   :  { %v599_v32 = vmax.f32 %v594_v31, 0.0 }
 0x11f   :  { %v600_v33 = vpack.c.bf16 %v599_v32, %v599_v32 }
 0x121   :  { %897 = vmatmul.mubr.bf16.vlgmr.msra.gmra.mrb[8].mxu1 %v600_v33 }
 0x1f4   :  { %v706_v35 = vpop.f32.mrb[8].mxu1 }
 0x1f5   :  { %v707_v36 = vadd.f32 %v788_v34, %v706_v35  ;;  %v898_v37 = vpop.f32.mrb[9].mxu1 }
 0x1f6   :  { %v709_v38 = vpop.f32.mrb[10].mxu1 }
 0x1f7   :  { %712 = vmax.xlane.f32.xlu0 %v707_v36  ;;  %v899_v39 = vpop.f32.mrb[11].mxu1 }
 0x284   :  { %v713_v40 = vpop.xlane.xlu0 %712 }
 0x285   :  { %v714_v41 = vsub.f32 %v707_v36, %v713_v40 }
 0x287   :  { %v715_v42 = vmul.f32 1.442695, %v714_v41 }
 0x289   :  { %960 = vpow2.f32 %v715_v42 }
 0x293   :  { %v961_v43 = vpop.eup %960 }
 0x294   :  { %717 = vadd.xlane.f32.xlu0 %v961_v43 }
 0x321   :  { %v718_v44 = vpop.xlane.xlu0 %717 }
 0x322   :  { %962 = vlog2.f32 %v718_v44 }
 0x32c   :  { %v963_v45 = vpop.eup %962 }
 0x32d   :  { %v720_v46 = vmul.f32 0.6931472, %v963_v45 }
 0x32f   :  { %v721_v47 = vsub.f32 %v714_v41, %v720_v46 }
 0x331   :  { %722 = vst [vmem:[#allocation2] sm:$0xff] %v721_v47 }
 0x332   :  { %975 = shalt.err (!%p972_p4)
}
 0x333   :  { %s976_s25 = scalar_lea.hbm %s1249_s5, 128 }
 0x334   :  { %p977_p5 = scmp.ne.s32.totalorder %s1249_s5, %s976_s25  ;;  %p980_p6 = scmp.lt.u32.totalorder %s976_s25, %s1249_s5 }
 0x336   :  { %p982_p7 = pnand %p980_p6, %p977_p5 }
 0x338   :  { %985 = shalt.err (!%p982_p7)
}
 0x339   :  { %732 = dma.vmem_to_hbm [thread:$0]  %s730_s22, 128, %s1249_s5, [#allocation3]  }
 0x33a   :  { %986 = dma.done.wait [#allocation3], 128  }
 0x33b   :  { %987 = vsyncadd [#allocation3], 4294967168 }
 0x33c   :  { %736 = vsyncpa [#allocation3], 1 }

</bundles_post_ra>
